<compile_context>
chip_gen: v7x
topology: tpu7x:2x2x1
jax: 0.10.0
libtpu: 0.0.40
codegen_flags: <defaults>
</compile_context>

<pallas_src>
import jax
import jax.numpy as jnp
from jax.experimental import pallas as pl
from jax.experimental.pallas import tpu as pltpu


_BLOCK = 128  # frames per grid step (lane width)


# ----------------------------------------------------------------------------
# Pallas kernel
# ----------------------------------------------------------------------------
def _rodrigues_rows(rx, ry, rz):
    """Rodrigues R = I + A*[r]_x + B*[r]_x^2, lane-major.

    rx/ry/rz are (1, BLOCK) rows (frames on lanes); returns the 9 rotation
    entries as (1, BLOCK) rows.  Small-angle branch uses the Taylor expansion,
    matching pytorch3d.axis_angle_to_matrix up to fp error.
    """
    th2 = rx * rx + ry * ry + rz * rz
    th = jnp.sqrt(th2)
    small = th2 < 1e-8
    safe_th = jnp.where(small, 1.0, th)
    safe_th2 = jnp.where(small, 1.0, th2)
    A = jnp.where(small, 1.0 - th2 / 6.0, jnp.sin(th) / safe_th)
    B = jnp.where(small, 0.5 - th2 / 24.0, (1.0 - jnp.cos(th)) / safe_th2)

    R00 = 1.0 - B * (ry * ry + rz * rz)
    R01 = -A * rz + B * rx * ry
    R02 = A * ry + B * rx * rz
    R10 = A * rz + B * rx * ry
    R11 = 1.0 - B * (rx * rx + rz * rz)
    R12 = -A * rx + B * ry * rz
    R20 = -A * ry + B * rx * rz
    R21 = A * rx + B * ry * rz
    R22 = 1.0 - B * (rx * rx + ry * ry)
    return ((R00, R01, R02), (R10, R11, R12), (R20, R21, R22))


def relpose_kernel(cam_ref, tab_ref, base_ref, out_ref):
    # cam_ref : (1, BLOCK) int32   -- frame ids for this block (frames on lanes)
    # tab_ref : (8, F)     f32     -- rows [rx, ry, rz, tx, ty, tz, 0, 0] per frame
    # base_ref: (1, 16)    f32     -- SMEM: precomposed base 4x4, row-major
    # out_ref : (16, BLOCK) f32    -- row 4*i+j = pose[i, j], frames on lanes
    F = tab_ref.shape[1]
    B = cam_ref.shape[1]

    # ---- fused gather r[cam_id], t[cam_id] via one one-hot matmul (MXU) ----
    cam = cam_ref[...]                                          # (1, B)
    rowid = jax.lax.broadcasted_iota(jnp.int32, (F, B), 0)      # (F, B)
    onehot = (rowid == cam).astype(jnp.float32)                 # (F, B)
    sel = jnp.dot(tab_ref[...], onehot,
                  preferred_element_type=jnp.float32)           # (8, B) lane-dense

    rx, ry, rz = sel[0:1, :], sel[1:2, :], sel[2:3, :]
    t_sel = (sel[3:4, :], sel[4:5, :], sel[5:6, :])

    # ---- per-frame rotation from axis-angle (all (1, B) rows) ----
    Rf = _rodrigues_rows(rx, ry, rz)

    # ---- base pose scalars (precomposed in wrapper, read from SMEM) ----
    Bm = [[base_ref[0, 4 * i + j] for j in range(3)] for i in range(3)]  # s*Rb
    bt = [base_ref[0, 4 * i + 3] for i in range(3)]                      # base_t

    # ---- frame_pose = [Rf | t_sel; 0 1] @ [s*Rb | bt; 0 1] ----
    Rout = [[Rf[i][0] * Bm[0][j] + Rf[i][1] * Bm[1][j] + Rf[i][2] * Bm[2][j]
             for j in range(3)] for i in range(3)]
    tout = [Rf[i][0] * bt[0] + Rf[i][1] * bt[1] + Rf[i][2] * bt[2] + t_sel[i]
            for i in range(3)]

    zeros = jnp.zeros((1, B), jnp.float32)
    ones = jnp.ones((1, B), jnp.float32)
    rows = [Rout[0][0], Rout[0][1], Rout[0][2], tout[0],
            Rout[1][0], Rout[1][1], Rout[1][2], tout[1],
            Rout[2][0], Rout[2][1], Rout[2][2], tout[2],
            zeros, zeros, zeros, ones]
    out_ref[...] = jnp.concatenate(rows, axis=0)                # (16, B)


# ----------------------------------------------------------------------------
# Pure-JAX helpers (hoisted base pose + reference)
# ----------------------------------------------------------------------------
def _aa_to_matrix(r):
    th2 = jnp.sum(r * r, axis=-1)
    th = jnp.sqrt(th2)
    small = th2 < 1e-8
    A = jnp.where(small, 1.0 - th2 / 6.0, jnp.sin(th) / jnp.where(small, 1.0, th))
    B = jnp.where(small, 0.5 - th2 / 24.0,
                  (1.0 - jnp.cos(th)) / jnp.where(small, 1.0, th2))
    rx, ry, rz = r[..., 0], r[..., 1], r[..., 2]
    z = jnp.zeros_like(rx)
    K = jnp.stack([jnp.stack([z, -rz, ry], -1),
                   jnp.stack([rz, z, -rx], -1),
                   jnp.stack([-ry, rx, z], -1)], -2)
    I = jnp.eye(3, dtype=r.dtype)
    return I + A[..., None, None] * K + B[..., None, None] * (K @ K)


# ----------------------------------------------------------------------------
# Wrapper: layout plumbing (pad frames to lane blocks, compose base, un-transpose)
# ----------------------------------------------------------------------------
def rel_pose_forward(cam_id, r, t, base_r, base_t, base_s, *, block=_BLOCK):
    """cam_id: (N,) int; r,t: (F,3) f32; base_r,base_t: (1,3); base_s: (1,1).

    Returns frame_pose: (N, 4, 4) float32 (same as the PyTorch module output)."""
    N = int(cam_id.shape[0])
    F = int(r.shape[0])
    n_pad = ((N + block - 1) // block) * block

    # clamp (PyTorch gather would error on OOB ids; padded lanes use id 0)
    cam = jnp.clip(cam_id.astype(jnp.int32), 0, F - 1)
    cam_p = jnp.zeros((1, n_pad), jnp.int32).at[0, :N].set(cam)

    # fused gather table: rows [rx, ry, rz, tx, ty, tz, 0, 0], frames on lanes.
    tab = jnp.concatenate(
        [r.T.astype(jnp.float32), t.T.astype(jnp.float32),
         jnp.zeros((2, F), jnp.float32)], axis=0)                 # (8, F)

    # hoisted base pose: [s*Rod(base_r) | base_t; 0 0 0 1], flattened row-major.
    Rb = _aa_to_matrix(base_r.astype(jnp.float32))[0]             # (3, 3)
    base = jnp.eye(4, dtype=jnp.float32)
    base = base.at[:3, :3].set(Rb * base_s[0, 0]).at[:3, 3].set(base_t[0])
    base16 = base.reshape(1, 16)

    out = pl.pallas_call(
        relpose_kernel,
        out_shape=jax.ShapeDtypeStruct((16, n_pad), jnp.float32),
        grid=(n_pad // block,),
        in_specs=[
            pl.BlockSpec((1, block), lambda i: (0, i)),           # cam ids
            pl.BlockSpec((8, F), lambda i: (0, 0)),               # r/t table
            pl.BlockSpec(memory_space=pltpu.MemorySpace.SMEM),    # base 4x4 scalars
        ],
        out_specs=pl.BlockSpec((16, block), lambda i: (0, i)),
        compiler_params=pltpu.CompilerParams(
            dimension_semantics=("parallel",)),
    )(cam_p, tab, base16)

    # (16, N) lane-dense -> (N, 4, 4); cheap glue in plain JAX.
    return out[:, :N].T.reshape(N, 4, 4)


# ----------------------------------------------------------------------------
# Pure-JAX reference (mirrors the PyTorch / pytorch3d math) for verification
# ----------------------------------------------------------------------------
def rel_pose_ref(cam_id, r, t, base_r, base_t, base_s):
    N = cam_id.shape[0]
    r_sel = r[cam_id]
    t_sel = t[cam_id]
    Rf = _aa_to_matrix(r_sel)                                     # (N,3,3)
    bottom = jnp.broadcast_to(jnp.array([[[0., 0., 0., 1.]]], jnp.float32),
                              (N, 1, 4))
    frameTbase = jnp.concatenate(
        [jnp.concatenate([Rf, t_sel[..., None]], -1), bottom], -2)  # (N,4,4)
    Rb = _aa_to_matrix(base_r)[0]                                 # (3,3)
    base = jnp.eye(4, dtype=jnp.float32)
    base = base.at[:3, :3].set(Rb * base_s[0, 0]).at[:3, 3].set(base_t[0])
    return frameTbase @ base


# ----------------------------------------------------------------------------
if __name__ == "__main__":
    num_frames, N = 16, 8

    # Deterministic parameter init.  The PyTorch __init__ zeros r/t and uses an
    # identity init_pose; we use small deterministic random values instead so the
    # kernel math (gather, Rodrigues, pose compose) is actually exercised.
    key = jax.random.PRNGKey(0)
    k1, k2, k3, k4, k5, k6 = jax.random.split(key, 6)
    r = 0.3 * jax.random.normal(k1, (num_frames, 3), jnp.float32)
    t = 0.5 * jax.random.normal(k2, (num_frames, 3), jnp.float32)
    base_r = 0.2 * jax.random.normal(k3, (1, 3), jnp.float32)
    base_t = 0.5 * jax.random.normal(k4, (1, 3), jnp.float32)
    base_s = 1.0 + 0.1 * jax.random.normal(k5, (1, 1), jnp.float32)
    cam_id = jax.random.randint(k6, (N,), 0, num_frames, jnp.int32)

    frame_pose = rel_pose_forward(cam_id, r, t, base_r, base_t, base_s)
    frame_pose = jax.block_until_ready(frame_pose)

    ref = rel_pose_ref(cam_id, r, t, base_r, base_t, base_s)
    assert frame_pose.shape == (N, 4, 4)
    assert jnp.allclose(frame_pose, ref, atol=1e-5, rtol=1e-5), (
        "mismatch vs reference")

    print("KERNEL_OK")
</pallas_src>

<mosaic_0001>
module attributes {stable_mosaic.version = 11 : i64} {
  func.func @relpose_kernel(%arg0: i32, %arg1: memref<1x128xi32, #tpu.memory_space<vmem>>, %arg2: memref<8x16xf32, #tpu.memory_space<vmem>>, %arg3: memref<1x16xf32, #tpu.memory_space<smem>>, %arg4: memref<16x128xf32, #tpu.memory_space<vmem>>) attributes {dimension_semantics = [#tpu.dimension_semantics<parallel>], iteration_bounds = array<i64: 1>, scalar_prefetch = 0 : i64, scratch_operands = 0 : i64, tpu.core_type = #tpu.core_type<tc>, window_params = [{transform_indices = @transform_0, window_bounds = array<i64: 1, 128>}, {pipeline_mode = #tpu.pipeline_mode<synchronous>, transform_indices = @transform_1, window_bounds = array<i64: 8, 16>}, {transform_indices = @transform_2, window_bounds = array<i64: 1, 16>}, {transform_indices = @transform_3, window_bounds = array<i64: 16, 128>}]} {
    %c0 = arith.constant 0 : index
    %c0_0 = arith.constant 0 : index
    %0 = vector.load %arg1[%c0, %c0_0] : memref<1x128xi32, #tpu.memory_space<vmem>>, vector<1x128xi32>
    %1 = tpu.iota {dimensions = array<i32: 0>} : vector<16x128xi32>
    %2 = vector.broadcast %0 : vector<1x128xi32> to vector<16x128xi32>
    %3 = arith.cmpi eq, %1, %2 : vector<16x128xi32>
    %4 = arith.extui %3 : vector<16x128xi1> to vector<16x128xi32>
    %5 = arith.sitofp %4 : vector<16x128xi32> to vector<16x128xf32>
    %c0_1 = arith.constant 0 : index
    %c0_2 = arith.constant 0 : index
    %6 = vector.load %arg2[%c0_1, %c0_2] : memref<8x16xf32, #tpu.memory_space<vmem>>, vector<8x16xf32>
    %cst = arith.constant dense<0.000000e+00> : vector<8x128xf32>
    %7 = tpu.matmul %6, %5, %cst {dimension_numbers = #tpu.dot_dimension_numbers<[1], [0], [0], [1], [0, 0, 1, 1], [], []>} : vector<8x16xf32>, vector<16x128xf32>, vector<8x128xf32> -> vector<8x128xf32>
    %8 = vector.extract_strided_slice %7 {offsets = [0, 0], sizes = [1, 128], strides = [1, 1]} : vector<8x128xf32> to vector<1x128xf32>
    %9 = vector.extract_strided_slice %7 {offsets = [1, 0], sizes = [1, 128], strides = [1, 1]} : vector<8x128xf32> to vector<1x128xf32>
    %10 = vector.extract_strided_slice %7 {offsets = [2, 0], sizes = [1, 128], strides = [1, 1]} : vector<8x128xf32> to vector<1x128xf32>
    %11 = vector.extract_strided_slice %7 {offsets = [3, 0], sizes = [1, 128], strides = [1, 1]} : vector<8x128xf32> to vector<1x128xf32>
    %12 = vector.extract_strided_slice %7 {offsets = [4, 0], sizes = [1, 128], strides = [1, 1]} : vector<8x128xf32> to vector<1x128xf32>
    %13 = vector.extract_strided_slice %7 {offsets = [5, 0], sizes = [1, 128], strides = [1, 1]} : vector<8x128xf32> to vector<1x128xf32>
    %14 = arith.mulf %8, %8 : vector<1x128xf32>
    %15 = arith.mulf %9, %9 : vector<1x128xf32>
    %16 = arith.addf %14, %15 : vector<1x128xf32>
    %17 = arith.mulf %10, %10 : vector<1x128xf32>
    %18 = arith.addf %16, %17 : vector<1x128xf32>
    %19 = math.sqrt %18 : vector<1x128xf32>
    %cst_3 = arith.constant 9.99999993E-9 : f32
    %20 = vector.broadcast %cst_3 : f32 to vector<1x128xf32>
    %21 = arith.cmpf olt, %18, %20 : vector<1x128xf32>
    %cst_4 = arith.constant 1.000000e+00 : f32
    %22 = vector.broadcast %cst_4 : f32 to vector<1x128xf32>
    %23 = arith.select %21, %22, %19 : vector<1x128xi1>, vector<1x128xf32>
    %cst_5 = arith.constant 1.000000e+00 : f32
    %24 = vector.broadcast %cst_5 : f32 to vector<1x128xf32>
    %25 = arith.select %21, %24, %18 : vector<1x128xi1>, vector<1x128xf32>
    %cst_6 = arith.constant 6.000000e+00 : f32
    %26 = vector.broadcast %cst_6 : f32 to vector<1x128xf32>
    %27 = arith.divf %18, %26 : vector<1x128xf32>
    %cst_7 = arith.constant 1.000000e+00 : f32
    %28 = vector.broadcast %cst_7 : f32 to vector<1x128xf32>
    %29 = arith.subf %28, %27 : vector<1x128xf32>
    %30 = math.sin %19 : vector<1x128xf32>
    %31 = arith.divf %30, %23 : vector<1x128xf32>
    %32 = arith.select %21, %29, %31 : vector<1x128xi1>, vector<1x128xf32>
    %cst_8 = arith.constant 2.400000e+01 : f32
    %33 = vector.broadcast %cst_8 : f32 to vector<1x128xf32>
    %34 = arith.divf %18, %33 : vector<1x128xf32>
    %cst_9 = arith.constant 5.000000e-01 : f32
    %35 = vector.broadcast %cst_9 : f32 to vector<1x128xf32>
    %36 = arith.subf %35, %34 : vector<1x128xf32>
    %37 = math.cos %19 : vector<1x128xf32>
    %cst_10 = arith.constant 1.000000e+00 : f32
    %38 = vector.broadcast %cst_10 : f32 to vector<1x128xf32>
    %39 = arith.subf %38, %37 : vector<1x128xf32>
    %40 = arith.divf %39, %25 : vector<1x128xf32>
    %41 = arith.select %21, %36, %40 : vector<1x128xi1>, vector<1x128xf32>
    %42 = arith.mulf %9, %9 : vector<1x128xf32>
    %43 = arith.mulf %10, %10 : vector<1x128xf32>
    %44 = arith.addf %42, %43 : vector<1x128xf32>
    %45 = arith.mulf %41, %44 : vector<1x128xf32>
    %cst_11 = arith.constant 1.000000e+00 : f32
    %46 = vector.broadcast %cst_11 : f32 to vector<1x128xf32>
    %47 = arith.subf %46, %45 : vector<1x128xf32>
    %cst_12 = arith.constant 0.000000e+00 : f32
    %48 = vector.broadcast %cst_12 : f32 to vector<1x128xf32>
    %49 = arith.subf %48, %32 : vector<1x128xf32>
    %50 = arith.mulf %49, %10 : vector<1x128xf32>
    %51 = arith.mulf %41, %8 : vector<1x128xf32>
    %52 = arith.mulf %51, %9 : vector<1x128xf32>
    %53 = arith.addf %50, %52 : vector<1x128xf32>
    %54 = arith.mulf %32, %9 : vector<1x128xf32>
    %55 = arith.mulf %41, %8 : vector<1x128xf32>
    %56 = arith.mulf %55, %10 : vector<1x128xf32>
    %57 = arith.addf %54, %56 : vector<1x128xf32>
    %58 = arith.mulf %32, %10 : vector<1x128xf32>
    %59 = arith.mulf %41, %8 : vector<1x128xf32>
    %60 = arith.mulf %59, %9 : vector<1x128xf32>
    %61 = arith.addf %58, %60 : vector<1x128xf32>
    %62 = arith.mulf %8, %8 : vector<1x128xf32>
    %63 = arith.mulf %10, %10 : vector<1x128xf32>
    %64 = arith.addf %62, %63 : vector<1x128xf32>
    %65 = arith.mulf %41, %64 : vector<1x128xf32>
    %cst_13 = arith.constant 1.000000e+00 : f32
    %66 = vector.broadcast %cst_13 : f32 to vector<1x128xf32>
    %67 = arith.subf %66, %65 : vector<1x128xf32>
    %cst_14 = arith.constant 0.000000e+00 : f32
    %68 = vector.broadcast %cst_14 : f32 to vector<1x128xf32>
    %69 = arith.subf %68, %32 : vector<1x128xf32>
    %70 = arith.mulf %69, %8 : vector<1x128xf32>
    %71 = arith.mulf %41, %9 : vector<1x128xf32>
    %72 = arith.mulf %71, %10 : vector<1x128xf32>
    %73 = arith.addf %70, %72 : vector<1x128xf32>
    %cst_15 = arith.constant 0.000000e+00 : f32
    %74 = vector.broadcast %cst_15 : f32 to vector<1x128xf32>
    %75 = arith.subf %74, %32 : vector<1x128xf32>
    %76 = arith.mulf %75, %9 : vector<1x128xf32>
    %77 = arith.mulf %41, %8 : vector<1x128xf32>
    %78 = arith.mulf %77, %10 : vector<1x128xf32>
    %79 = arith.addf %76, %78 : vector<1x128xf32>
    %80 = arith.mulf %32, %8 : vector<1x128xf32>
    %81 = arith.mulf %41, %9 : vector<1x128xf32>
    %82 = arith.mulf %81, %10 : vector<1x128xf32>
    %83 = arith.addf %80, %82 : vector<1x128xf32>
    %84 = arith.mulf %8, %8 : vector<1x128xf32>
    %85 = arith.mulf %9, %9 : vector<1x128xf32>
    %86 = arith.addf %84, %85 : vector<1x128xf32>
    %87 = arith.mulf %41, %86 : vector<1x128xf32>
    %cst_16 = arith.constant 1.000000e+00 : f32
    %88 = vector.broadcast %cst_16 : f32 to vector<1x128xf32>
    %89 = arith.subf %88, %87 : vector<1x128xf32>
    %c0_17 = arith.constant 0 : index
    %c0_18 = arith.constant 0 : index
    %90 = memref.load %arg3[%c0_17, %c0_18] : memref<1x16xf32, #tpu.memory_space<smem>>
    %c0_19 = arith.constant 0 : index
    %c1 = arith.constant 1 : index
    %91 = memref.load %arg3[%c0_19, %c1] : memref<1x16xf32, #tpu.memory_space<smem>>
    %c0_20 = arith.constant 0 : index
    %c2 = arith.constant 2 : index
    %92 = memref.load %arg3[%c0_20, %c2] : memref<1x16xf32, #tpu.memory_space<smem>>
    %c0_21 = arith.constant 0 : index
    %c4 = arith.constant 4 : index
    %93 = memref.load %arg3[%c0_21, %c4] : memref<1x16xf32, #tpu.memory_space<smem>>
    %c0_22 = arith.constant 0 : index
    %c5 = arith.constant 5 : index
    %94 = memref.load %arg3[%c0_22, %c5] : memref<1x16xf32, #tpu.memory_space<smem>>
    %c0_23 = arith.constant 0 : index
    %c6 = arith.constant 6 : index
    %95 = memref.load %arg3[%c0_23, %c6] : memref<1x16xf32, #tpu.memory_space<smem>>
    %c0_24 = arith.constant 0 : index
    %c8 = arith.constant 8 : index
    %96 = memref.load %arg3[%c0_24, %c8] : memref<1x16xf32, #tpu.memory_space<smem>>
    %c0_25 = arith.constant 0 : index
    %c9 = arith.constant 9 : index
    %97 = memref.load %arg3[%c0_25, %c9] : memref<1x16xf32, #tpu.memory_space<smem>>
    %c0_26 = arith.constant 0 : index
    %c10 = arith.constant 10 : index
    %98 = memref.load %arg3[%c0_26, %c10] : memref<1x16xf32, #tpu.memory_space<smem>>
    %c0_27 = arith.constant 0 : index
    %c3 = arith.constant 3 : index
    %99 = memref.load %arg3[%c0_27, %c3] : memref<1x16xf32, #tpu.memory_space<smem>>
    %c0_28 = arith.constant 0 : index
    %c7 = arith.constant 7 : index
    %100 = memref.load %arg3[%c0_28, %c7] : memref<1x16xf32, #tpu.memory_space<smem>>
    %c0_29 = arith.constant 0 : index
    %c11 = arith.constant 11 : index
    %101 = memref.load %arg3[%c0_29, %c11] : memref<1x16xf32, #tpu.memory_space<smem>>
    %102 = vector.broadcast %90 : f32 to vector<1x128xf32>
    %103 = arith.mulf %47, %102 : vector<1x128xf32>
    %104 = vector.broadcast %93 : f32 to vector<1x128xf32>
    %105 = arith.mulf %53, %104 : vector<1x128xf32>
    %106 = arith.addf %103, %105 : vector<1x128xf32>
    %107 = vector.broadcast %96 : f32 to vector<1x128xf32>
    %108 = arith.mulf %57, %107 : vector<1x128xf32>
    %109 = arith.addf %106, %108 : vector<1x128xf32>
    %110 = vector.broadcast %91 : f32 to vector<1x128xf32>
    %111 = arith.mulf %47, %110 : vector<1x128xf32>
    %112 = vector.broadcast %94 : f32 to vector<1x128xf32>
    %113 = arith.mulf %53, %112 : vector<1x128xf32>
    %114 = arith.addf %111, %113 : vector<1x128xf32>
    %115 = vector.broadcast %97 : f32 to vector<1x128xf32>
    %116 = arith.mulf %57, %115 : vector<1x128xf32>
    %117 = arith.addf %114, %116 : vector<1x128xf32>
    %118 = vector.broadcast %92 : f32 to vector<1x128xf32>
    %119 = arith.mulf %47, %118 : vector<1x128xf32>
    %120 = vector.broadcast %95 : f32 to vector<1x128xf32>
    %121 = arith.mulf %53, %120 : vector<1x128xf32>
    %122 = arith.addf %119, %121 : vector<1x128xf32>
    %123 = vector.broadcast %98 : f32 to vector<1x128xf32>
    %124 = arith.mulf %57, %123 : vector<1x128xf32>
    %125 = arith.addf %122, %124 : vector<1x128xf32>
    %126 = vector.broadcast %90 : f32 to vector<1x128xf32>
    %127 = arith.mulf %61, %126 : vector<1x128xf32>
    %128 = vector.broadcast %93 : f32 to vector<1x128xf32>
    %129 = arith.mulf %67, %128 : vector<1x128xf32>
    %130 = arith.addf %127, %129 : vector<1x128xf32>
    %131 = vector.broadcast %96 : f32 to vector<1x128xf32>
    %132 = arith.mulf %73, %131 : vector<1x128xf32>
    %133 = arith.addf %130, %132 : vector<1x128xf32>
    %134 = vector.broadcast %91 : f32 to vector<1x128xf32>
    %135 = arith.mulf %61, %134 : vector<1x128xf32>
    %136 = vector.broadcast %94 : f32 to vector<1x128xf32>
    %137 = arith.mulf %67, %136 : vector<1x128xf32>
    %138 = arith.addf %135, %137 : vector<1x128xf32>
    %139 = vector.broadcast %97 : f32 to vector<1x128xf32>
    %140 = arith.mulf %73, %139 : vector<1x128xf32>
    %141 = arith.addf %138, %140 : vector<1x128xf32>
    %142 = vector.broadcast %92 : f32 to vector<1x128xf32>
    %143 = arith.mulf %61, %142 : vector<1x128xf32>
    %144 = vector.broadcast %95 : f32 to vector<1x128xf32>
    %145 = arith.mulf %67, %144 : vector<1x128xf32>
    %146 = arith.addf %143, %145 : vector<1x128xf32>
    %147 = vector.broadcast %98 : f32 to vector<1x128xf32>
    %148 = arith.mulf %73, %147 : vector<1x128xf32>
    %149 = arith.addf %146, %148 : vector<1x128xf32>
    %150 = vector.broadcast %90 : f32 to vector<1x128xf32>
    %151 = arith.mulf %79, %150 : vector<1x128xf32>
    %152 = vector.broadcast %93 : f32 to vector<1x128xf32>
    %153 = arith.mulf %83, %152 : vector<1x128xf32>
    %154 = arith.addf %151, %153 : vector<1x128xf32>
    %155 = vector.broadcast %96 : f32 to vector<1x128xf32>
    %156 = arith.mulf %89, %155 : vector<1x128xf32>
    %157 = arith.addf %154, %156 : vector<1x128xf32>
    %158 = vector.broadcast %91 : f32 to vector<1x128xf32>
    %159 = arith.mulf %79, %158 : vector<1x128xf32>
    %160 = vector.broadcast %94 : f32 to vector<1x128xf32>
    %161 = arith.mulf %83, %160 : vector<1x128xf32>
    %162 = arith.addf %159, %161 : vector<1x128xf32>
    %163 = vector.broadcast %97 : f32 to vector<1x128xf32>
    %164 = arith.mulf %89, %163 : vector<1x128xf32>
    %165 = arith.addf %162, %164 : vector<1x128xf32>
    %166 = vector.broadcast %92 : f32 to vector<1x128xf32>
    %167 = arith.mulf %79, %166 : vector<1x128xf32>
    %168 = vector.broadcast %95 : f32 to vector<1x128xf32>
    %169 = arith.mulf %83, %168 : vector<1x128xf32>
    %170 = arith.addf %167, %169 : vector<1x128xf32>
    %171 = vector.broadcast %98 : f32 to vector<1x128xf32>
    %172 = arith.mulf %89, %171 : vector<1x128xf32>
    %173 = arith.addf %170, %172 : vector<1x128xf32>
    %174 = vector.broadcast %99 : f32 to vector<1x128xf32>
    %175 = arith.mulf %47, %174 : vector<1x128xf32>
    %176 = vector.broadcast %100 : f32 to vector<1x128xf32>
    %177 = arith.mulf %53, %176 : vector<1x128xf32>
    %178 = arith.addf %175, %177 : vector<1x128xf32>
    %179 = vector.broadcast %101 : f32 to vector<1x128xf32>
    %180 = arith.mulf %57, %179 : vector<1x128xf32>
    %181 = arith.addf %178, %180 : vector<1x128xf32>
    %182 = arith.addf %181, %11 : vector<1x128xf32>
    %183 = vector.broadcast %99 : f32 to vector<1x128xf32>
    %184 = arith.mulf %61, %183 : vector<1x128xf32>
    %185 = vector.broadcast %100 : f32 to vector<1x128xf32>
    %186 = arith.mulf %67, %185 : vector<1x128xf32>
    %187 = arith.addf %184, %186 : vector<1x128xf32>
    %188 = vector.broadcast %101 : f32 to vector<1x128xf32>
    %189 = arith.mulf %73, %188 : vector<1x128xf32>
    %190 = arith.addf %187, %189 : vector<1x128xf32>
    %191 = arith.addf %190, %12 : vector<1x128xf32>
    %192 = vector.broadcast %99 : f32 to vector<1x128xf32>
    %193 = arith.mulf %79, %192 : vector<1x128xf32>
    %194 = vector.broadcast %100 : f32 to vector<1x128xf32>
    %195 = arith.mulf %83, %194 : vector<1x128xf32>
    %196 = arith.addf %193, %195 : vector<1x128xf32>
    %197 = vector.broadcast %101 : f32 to vector<1x128xf32>
    %198 = arith.mulf %89, %197 : vector<1x128xf32>
    %199 = arith.addf %196, %198 : vector<1x128xf32>
    %200 = arith.addf %199, %13 : vector<1x128xf32>
    %cst_30 = arith.constant 0.000000e+00 : f32
    %201 = vector.broadcast %cst_30 : f32 to vector<1x128xf32>
    %cst_31 = arith.constant 1.000000e+00 : f32
    %202 = vector.broadcast %cst_31 : f32 to vector<1x128xf32>
    %203 = tpu.concatenate %109, %117, %125, %182, %133, %141, %149, %191, %157, %165, %173, %200, %201, %201, %201, %202 in 0 : vector<1x128xf32>, vector<1x128xf32>, vector<1x128xf32>, vector<1x128xf32>, vector<1x128xf32>, vector<1x128xf32>, vector<1x128xf32>, vector<1x128xf32>, vector<1x128xf32>, vector<1x128xf32>, vector<1x128xf32>, vector<1x128xf32>, vector<1x128xf32>, vector<1x128xf32>, vector<1x128xf32>, vector<1x128xf32> -> vector<16x128xf32>
    %c0_32 = arith.constant 0 : index
    %c0_33 = arith.constant 0 : index
    %204 = vector.load %arg4[%c0_32, %c0_33] : memref<16x128xf32, #tpu.memory_space<vmem>>, vector<16x128xf32>
    tpu.vector_store %arg4[%c0_32, %c0_33], %203 {strides = array<i32>} : memref<16x128xf32, #tpu.memory_space<vmem>>, vector<16x128xf32>,
    return
  }
  func.func @transform_0(%arg0: i32) -> (i32, i32) {
    %c0_i32 = arith.constant 0 : i32
    %c0_i32_0 = arith.constant 0 : i32
    return %c0_i32, %arg0 : i32, i32
  }
  func.func @transform_1(%arg0: i32) -> (i32, i32) {
    %c0_i32 = arith.constant 0 : i32
    %c0_i32_0 = arith.constant 0 : i32
    %c0_i32_1 = arith.constant 0 : i32
    return %c0_i32, %c0_i32_0 : i32, i32
  }
  func.func @transform_2(%arg0: i32) -> (i32, i32) {
    %c0_i32 = arith.constant 0 : i32
    %c0_i32_0 = arith.constant 0 : i32
    %c0_i32_1 = arith.constant 0 : i32
    return %c0_i32, %c0_i32_0 : i32, i32
  }
  func.func @transform_3(%arg0: i32) -> (i32, i32) {
    %c0_i32 = arith.constant 0 : i32
    %c0_i32_0 = arith.constant 0 : i32
    return %c0_i32, %arg0 : i32, i32
  }
}

</mosaic_0001>

<bundles_post_ra>
// kernel: tpu_custom_call.1
= control target key start
LH: loop header
LB: loop body
LE: loop exit
PB: predicated region body
PF: predicated region fallthrough
CT: control target
= control target key end

     0   :  { %8 = vsyncpa [#allocation3], 0  ;;  %s973_s0 = inlined_call_operand.hbm [shape: s32[1,128], index: 0, kind: input, shape index: {}]   ;;  %s974_s1 = inlined_call_operand.hbm [shape: f32[8,16], index: 1, kind: input, shape index: {}]   ;;  %s975_s2 = inlined_call_operand.vmem [shape: f32[1,16], index: 2, kind: input, shape index: {}]   ;;  %s976_s3 = inlined_call_operand.hbm [shape: f32[16,128], index: 3, kind: output, shape index: {}]  }
   0x1   :  { %9 = vsyncpa [#allocation7], 0 }
   0x2   :  { %10 = vsyncpa [#allocation5], 0 }
   0x3   :  { %11 = vsyncpa [#allocation4], 0  ;;  %s731_s12 = smov [#allocation2]   ;;  %s732_s14 = smov [#allocation6]  }
   0x4   :  { %s18_s13 = sshll.u32 %s731_s12, 4  ;;  %s28_s15 = sshll.u32 %s732_s14, 4  ;;  %s19_s13 = int_to_ptr.vmem [resolvable:$true] %s18_s13  ;;  %s29_s15 = int_to_ptr.vmem [resolvable:$true] %s28_s15 }
   0x5   :  { %s645_s18 = scalar_lea.hbm %s973_s0, 16 }
   0x6   :  { %p646_p0 = scmp.ne.s32.totalorder %s973_s0, %s645_s18  ;;  %p649_p1 = scmp.lt.u32.totalorder %s645_s18, %s973_s0 }
   0x8   :  { %p651_p2 = pnand %p649_p1, %p646_p0 }
   0xa   :  { %654 = shalt.err (!%p651_p2)
}
   0xb   :  { %s655_s23 = scalar_lea.vmem %s19_s13, 16  ;;  %s659_s24 = scalar_lea.vmem %s19_s13, 32 }
   0xc   :  { %p656_p3 = scmp.ne.s32.totalorder %s19_s13, %s655_s23  ;;  %p660_p4 = scmp.lt.s32.totalorder %s19_s13, %s19_s13 }
   0xd   :  { %p661_p5 = scmp.lt.s32.totalorder %s659_s24, %s655_s23 }
   0xf   :  { %p662_p6 = por %p661_p5, %p660_p4 }
  0x11   :  { %p663_p7 = pnand %p662_p6, %p656_p3 }
  0x13   :  { %666 = shalt.err (!%p663_p7)
}
  0x14   :  { %21 = dma.hbm_to_vmem [thread:$0]  %s973_s0, 16, %s19_s13, [#allocation3]  }
  0x15   :  { %s667_s29 = scalar_lea.hbm %s974_s1, 128 }
  0x16   :  { %p668_p8 = scmp.ne.s32.totalorder %s974_s1, %s667_s29  ;;  %p671_p9 = scmp.lt.u32.totalorder %s667_s29, %s974_s1 }
  0x18   :  { %p673_p10 = pnand %p671_p9, %p668_p8 }
  0x1a   :  { %676 = shalt.err (!%p673_p10)
}
  0x1b   :  { %s677_s7 = scalar_lea.vmem %s29_s15, 128  ;;  %p682_p12 = scmp.lt.s32.totalorder %s29_s15, %s29_s15 }
  0x1c   :  { %p678_p11 = scmp.ne.s32.totalorder %s29_s15, %s677_s7  ;;  %p683_p13 = scmp.lt.s32.totalorder %s677_s7, %s677_s7 }
  0x1e   :  { %p684_p0 = por %p683_p13, %p682_p12 }
  0x20   :  { %p685_p1 = pnand %p684_p0, %p678_p11 }
  0x22   :  { %688 = shalt.err (!%p685_p1)
}
  0x23   :  { %31 = dma.hbm_to_vmem [thread:$0]  %s974_s1, 128, %s29_s15, [#allocation7]  }
  0x24   :  { %s38_s11 = sshll.u32 %s975_s2, 4  ;;  %s39_s11 = int_to_ptr.vmem [resolvable:$true] %s38_s11 }
  0x25   :  { %s689_s12 = scalar_lea.vmem %s39_s11, 16  ;;  %p694_p3 = scmp.lt.s32.totalorder %s39_s11, %s39_s11 }
  0x26   :  { %p690_p2 = scmp.ne.s32.totalorder %s39_s11, %s689_s12  ;;  %p695_p4 = scmp.lt.s32.totalorder %s689_s12, %s689_s12 }
  0x28   :  { %p696_p5 = por %p695_p4, %p694_p3 }
  0x2a   :  { %p697_p6 = pnand %p696_p5, %p690_p2 }
  0x2c   :  { %700 = shalt.err (!%p697_p6)
}
  0x2d   :  { %s733_s13 = smov [#allocation8]  }
  0x2e   :  { %41 = dma.vmem_to_smem %s39_s11, 16, %s733_s13, [#allocation5]  }
  0x2f   :  { %723 = dma.done.wait [#allocation3], 16  }
  0x30   :  { %724 = vsyncadd [#allocation3], 4294967280 }
  0x31   :  { %725 = dma.done.wait [#allocation7], 128  }
  0x32   :  { %726 = vsyncadd [#allocation7], 4294967168 }
  0x33   :  { %727 = dma.done.wait [#allocation5], 16  }
  0x34   :  { %728 = vsyncadd [#allocation5], 4294967280 }
  0x35   :  { %51 = sfence }
  0x36   :  { %v53_v0 = vlaneseq  ;;  %v734_v1 = vmov 0.0|0.0   ;;  %v577_v2 = vld [vmem:[#allocation2] ss:$0 sm:$0xff]  ;;  %vm735_vm0 = vmmov 0   ;;  %v736_v4 = vmov 0.0   ;;  %v66_v7 = vld [vmem:[#allocation6] sm:$0xff] }
  0x37   :  { %612 = vmatprep.subr.bf16.mxu0 %v734_v1  ;;  %609 = vmatprep.mubr.msk.f32.mxu0 %vm735_vm0, %v736_v4  ;;  %v737_v6 = vmov 1.0|1.0   ;;  %vm67_vm4 = vcmask 130048   ;;  %v738_v32 = vmov 683565275   ;;  %s412_s1 = sld [smem:[#allocation8]] }
  0x38   :  { %v54_v3 = vshrl.u32 %v53_v0, 7  ;;  %v739_v34 = vmov 2475754826   ;;  %v740_v37 = vmov 2131351028   ;;  %s591_s2 = sld [smem:[#allocation8 + $0x1]] }
  0x39   :  { %v741_v40 = vmov 2102212464   ;;  %v742_v43 = vmov 920167782   ;;  %v743_v46 = vmov 1326507024  }
  0x3a   :  { %v55_v5 = vadd.s32 8, %v54_v3  ;;  %vm60_vm1 = vcmp.eq.s32.totalorder %v54_v3, %v577_v2  ;;  %s841_s14 = sld [smem:[#allocation8 + $0x2]]  ;;  %s843_s15 = sld [smem:[#allocation8 + $0x4]] }
  0x3b   :  { %s845_s16 = sld [smem:[#allocation8 + $0x5]]  ;;  %s847_s17 = sld [smem:[#allocation8 + $0x6]] }
  0x3c   :  { %vm61_vm2 = vcmp.eq.s32.totalorder %v55_v5, %v577_v2  ;;  %s849_s18 = sld [smem:[#allocation8 + $0x8]]  ;;  %s851_s19 = sld [smem:[#allocation8 + $0x9]] }
  0x3d   :  { %vm613_vm3 = vmpackc.low %vm61_vm2, %vm60_vm1  ;;  %s858_s20 = sld [smem:[#allocation8 + $0xa]]  ;;  %s860_s21 = sld [smem:[#allocation8 + $0x3]] }
  0x3e   :  { %614 = vmatpush3.bf16.msk.msra.mxu0 %vm613_vm3, %v737_v6  ;;  %s864_s22 = sld [smem:[#allocation8 + $0x7]]  ;;  %s866_s23 = sld [smem:[#allocation8 + $0xb]] }
  0x3f   :  { %s744_s24 = smov [#allocation9]  }
  0x40   :  { %s563_s25 = sshll.u32 %s744_s24, 4  ;;  %s564_s25 = int_to_ptr.vmem [resolvable:$true] %s563_s25 }
  0x41   :  { %610 = vmatmul.mubr.msk.f32.vlgmr.msra.gmra.mrb[0].mxu0 %vm67_vm4, %v66_v7  ;;  %s701_s26 = scalar_lea.vmem %s564_s25, 256  ;;  %p706_p8 = scmp.lt.s32.totalorder %s564_s25, %s564_s25 }
  0x42   :  { %p702_p7 = scmp.ne.s32.totalorder %s564_s25, %s701_s26  ;;  %p707_p9 = scmp.lt.s32.totalorder %s701_s26, %s701_s26 }
  0x44   :  { %p708_p10 = por %p707_p9, %p706_p8 }
  0x46   :  { %p709_p11 = pnand %p708_p10, %p702_p7 }
 0x114   :  { %v794_v8 = vpop.f32.mrb[0].mxu0 }
 0x115   :  { %v141_v9 = vmul.f32 %v794_v8, %v794_v8  ;;  %v611_v10 = vpop.f32.mrb[1].mxu0 }
 0x117   :  { %v143_v11 = vrot.slane %v141_v9, 1  ;;  %v146_v12 = vrot.slane %v141_v9, 2 }
 0x119   :  { %v798_v13 = vadd.f32 %v143_v11, %v141_v9  ;;  %v800_v14 = vadd.f32 %v146_v12, %v141_v9 }
 0x11b   :  { %v803_v15 = vadd.f32 %v146_v12, %v798_v13 }
 0x11d   :  { %635 = vrsqrt.f32 %v803_v15  ;;  %vm151_vm5 = vcmp.eq.f32.partialorder %v803_v15, inf  ;;  %v154_v18 = vand.u32 2147483648, %v803_v15  ;;  %vm153_vm6 = vcmp.eq.f32.partialorder %v803_v15, 0.0 }
 0x11e   :  { %vm156_vm7 = vcmp.lt.f32.partialorder %v803_v15, 1e-08 }
 0x127   :  { %v636_v16 = vpop.eup %635 }
 0x128   :  { %v150_v17 = vmul.f32 %v636_v16, %v803_v15 }
 0x12a   :  { %v152_v19 = vsel %vm151_vm5, %v803_v15, %v150_v17 }
 0x12b   :  { %v811_v20 = vsel %vm153_vm6, %v154_v18, %v152_v19 }
 0x12c   :  { %v817_v21 = vsel %vm156_vm7, 1.0, %v811_v20  ;;  %v165_v22 = vand.u32 2139095040, %v811_v20  ;;  %v162_v26 = vand.u32 2147483647, %v811_v20  ;;  %vm164_vm15 = vcmp.lt.s32.totalorder %v811_v20, 0 }
 0x12e   :  { %v166_v23 = vshrl.u32 %v165_v22, 23  ;;  %v169_v29 = vand.u32 8388607, %v162_v26  ;;  %vm163_vm0 = vcmp.le.f32.partialorder %v162_v26, 0.7853982 }
 0x130   :  { %v583_v24 = vadd.s32 4294967169, %v166_v23  ;;  %v170_v48 = vor.u32 8388608, %v169_v29 }
 0x132   :  { %v172_v25 = vadd.s32 1, %v583_v24  ;;  %v210_v62 = vshll.u32 %v170_v48, 8 }
 0x134   :  { %vm173_vm8 = vcmp.gt.s32.totalorder %v172_v25, 0 }
 0x135   :  { %v174_v27 = vsel %vm173_vm8, %v172_v25, 0  ;;  %vm254_vm8 = vweird.f32 %v811_v20 }
 0x136   :  { %v176_v28 = vand.u32 31, %v174_v27  ;;  %v175_v31 = vshrl.u32 %v174_v27, 5 }
 0x138   :  { %v177_v30 = vsub.s32 32, %v176_v28  ;;  %v179_v33 = vshll.u32 %v738_v32, %v176_v28  ;;  %v182_v35 = vshll.u32 %v739_v34, %v176_v28  ;;  %v185_v39 = vshll.u32 %v740_v37, %v176_v28 }
 0x139   :  { %v188_v42 = vshll.u32 %v741_v40, %v176_v28  ;;  %v191_v45 = vshll.u32 %v742_v43, %v176_v28  ;;  %vm194_vm9 = vcmp.lt.s32.totalorder %v175_v31, 1  ;;  %vm197_vm10 = vcmp.lt.s32.totalorder %v175_v31, 4 }
 0x13a   :  { %v180_v36 = vshrl.u32 %v739_v34, %v177_v30  ;;  %v183_v38 = vshrl.u32 %v740_v37, %v177_v30  ;;  %v186_v41 = vshrl.u32 %v741_v40, %v177_v30  ;;  %v189_v44 = vshrl.u32 %v742_v43, %v177_v30 }
 0x13b   :  { %v192_v47 = vshrl.u32 %v743_v46, %v177_v30  ;;  %v178_v57 = vshrl.u32 %v738_v32, %v177_v30  ;;  %vm196_vm11 = vcmp.lt.s32.totalorder %v175_v31, 3  ;;  %vm195_vm12 = vcmp.lt.s32.totalorder %v175_v31, 2 }
 0x13c   :  { %v181_v49 = vor.u32 %v180_v36, %v179_v33  ;;  %v184_v50 = vor.u32 %v183_v38, %v182_v35  ;;  %v187_v51 = vor.u32 %v186_v41, %v185_v39  ;;  %v190_v52 = vor.u32 %v189_v44, %v188_v42 }
 0x13d   :  { %v193_v53 = vor.u32 %v192_v47, %v191_v45  ;;  %v158_v47 = vsel %vm156_vm7, 1.0, %v803_v15 }
 0x13e   :  { %v199_v54 = vsel %vm197_vm10, %v187_v51, 2102212464  ;;  %v202_v55 = vsel %vm194_vm9, %v181_v49, %v184_v50  ;;  %v206_v56 = vsel %vm194_vm9, %v184_v50, %v187_v51  ;;  %v203_v58 = vsel %vm197_vm10, %v190_v52, 920167782 }
 0x13f   :  { %v207_v59 = vsel %vm197_vm10, %v193_v53, 1326507024  ;;  %v204_v60 = vsel %vm196_vm11, %v187_v51, %v203_v58  ;;  %v198_v63 = vsel %vm194_vm9, %v178_v57, %v181_v49  ;;  %v200_v0 = vsel %vm196_vm11, %v184_v50, %v199_v54 }
 0x140   :  { %v208_v61 = vsel %vm196_vm11, %v190_v52, %v207_v59  ;;  %v205_v1 = vsel %vm195_vm12, %v202_v55, %v204_v60  ;;  %v201_v7 = vsel %vm195_vm12, %v198_v63, %v200_v0  ;;  %v853_v52 = vstv %s412_s1 }
 0x141   :  { %v209_v2 = vsel %vm195_vm12, %v206_v56, %v208_v61  ;;  %v826_v5 = vmul.u32.u64.low %v210_v62, %v205_v1  ;;  %v827_v6 = vmul.u32.u64.high %v210_v62, %v205_v1, %v826_v5  ;;  %v217_v10 = vmul.u32 %v210_v62, %v201_v7 }
 0x142   :  { %v823_v3 = vmul.u32.u64.low %v210_v62, %v209_v2  ;;  %v824_v4 = vmul.u32.u64.high %v210_v62, %v209_v2, %v823_v3  ;;  %v160_v53 = vmul.f32 0.16666667, %v803_v15  ;;  %v270_v60 = vmul.f32 0.041666668, %v803_v15 }
 0x143   :  { %v220_v9 = vadd.s32 1, %v827_v6  ;;  %v869_v1 = vstv %s843_s15  ;;  %v872_v2 = vstv %s841_s14  ;;  %v386_v7 = vrot.slane %v794_v8, 2 }
 0x144   :  { %vm219_vm13 = vc.u32 %v824_v4, %v826_v5  ;;  %v218_v28 = vadd.s32 %v826_v5, %v824_v4  ;;  %v161_v3 = vsub.f32 1.0, %v160_v53  ;;  %v875_v5 = vstv %s845_s16 }
 0x145   :  { %v221_v11 = vsel %vm219_vm13, %v220_v9, %v827_v6  ;;  %v390_v9 = vrot.slane %v794_v8, 1  ;;  %vm537_vm9 = vcmask 1041408   ;;  %vm539_vm10 = vcmask 1042432  }
 0x146   :  { %v222_v12 = vadd.s32 %v221_v11, %v217_v10  ;;  %v880_v10 = vstv %s849_s18  ;;  %v883_v11 = vstv %s847_s17  ;;  %vm541_vm11 = vcmask 1043456  }
 0x147   :  { %vm543_vm12 = vcmask 1044480   ;;  %vm545_vm13 = vcmask 1045504  }
 0x148   :  { %v223_v16 = vadd.s32 536870912, %v222_v12 }
 0x14a   :  { %v224_v17 = vshrl.u32 %v223_v16, 30  ;;  %v271_v16 = vsub.f32 0.5, %v270_v60 }
 0x14c   :  { %v225_v18 = vshll.u32 %v224_v17, 30  ;;  %v248_v40 = vsub.s32 4, %v224_v17 }
 0x14e   :  { %v226_v19 = vsub.s32 %v222_v12, %v225_v18  ;;  %v249_v43 = vsel %vm164_vm15, %v248_v40, %v224_v17  ;;  %v888_v18 = vstv %s851_s19  ;;  %v908_v40 = vstv %s866_s23 }
 0x14f   :  { %v251_v45 = vsel %vm163_vm0, 0, %v249_v43 }
 0x150   :  { %v228_v22 = vsub.s32 0, %v226_v19  ;;  %v255_v46 = vadd.s32 3, %v251_v45  ;;  %v365_v49 = vand.u32 3, %v251_v45 }
 0x152   :  { %v584_v23 = vmin.u32 %v228_v22, %v226_v19  ;;  %v256_v48 = vand.u32 3, %v255_v46  ;;  %vm370_vm2 = vcmp.eq.s32.totalorder %v365_v49, 2  ;;  %vm367_vm4 = vcmp.eq.s32.totalorder %v365_v49, 0 }
 0x153   :  { %vm366_vm6 = vcmp.lt.s32.totalorder %v365_v49, 2 }
 0x154   :  { %v230_v24 = vclz %v584_v23  ;;  %vm261_vm1 = vcmp.eq.s32.totalorder %v256_v48, 2  ;;  %vm258_vm3 = vcmp.eq.s32.totalorder %v256_v48, 0  ;;  %vm257_vm5 = vcmp.lt.s32.totalorder %v256_v48, 2 }
 0x156   :  { %v585_v25 = vadd.s32 4294967294, %v230_v24 }
 0x158   :  { %vm586_vm14 = vcmp.lt.s32.totalorder %v585_v25, 0 }
 0x159   :  { %v233_v27 = vsel %vm586_vm14, 0, %v585_v25  ;;  %vm547_vm14 = vcmask 1046528  }
 0x15a   :  { %v234_v29 = vsub.s32 32, %v233_v27  ;;  %v238_v30 = vsub.s32 4294967266, %v233_v27  ;;  %v235_v31 = vshll.u32 %v226_v19, %v233_v27  ;;  %v380_v27 = vrot.slane %v798_v13, 1 }
 0x15c   :  { %v236_v32 = vshrl.u32 %v218_v28, %v234_v29  ;;  %v239_v33 = vadd.s32 127, %v238_v30  ;;  %v895_v28 = vstv %s858_s20  ;;  %v898_v29 = vstv %s860_s21 }
 0x15e   :  { %v237_v34 = vor.u32 %v236_v32, %v235_v31  ;;  %v240_v35 = vshll.u32 %v239_v33, 23 }
 0x160   :  { %v241_v36 = vor.u32 4788187, %v240_v35  ;;  %v244_v38 = vcvt.s32.f32 %v237_v34 }
 0x162   :  { %v242_v37 = vand.u32 2147483647, %v241_v36 }
 0x164   :  { %v245_v39 = vmul.f32 %v244_v38, %v242_v37 }
 0x166   :  { %v246_v41 = vxor.u32 2147483648, %v245_v39 }
 0x168   :  { %v247_v42 = vsel %vm164_vm15, %v246_v41, %v245_v39  ;;  %v905_v39 = vstv %s864_s22 }
 0x169   :  { %v250_v44 = vsel %vm163_vm0, %v811_v20, %v247_v42 }
 0x16a   :  { %637 = vcosq.f32 %v250_v44 }
 0x16b   :  { %639 = vsinq.f32 %v250_v44  ;;  %v486_v44 = vrot.slane %v794_v8, 3 }
 0x16c   :  { %641 = vrcp.f32 %v817_v21  ;;  %v855_v21 = vstv %s591_s2 }
 0x16d   :  { %643 = vrcp.f32 %v158_v47 }
 0x174   :  { %v638_v26 = vpop.eup %637 }
 0x175   :  { %v640_v50 = vpop.eup %639  ;;  %v262_v51 = vxor.u32 2147483648, %v638_v26 }
 0x176   :  { %v259_v54 = vxor.u32 2147483648, %v640_v50  ;;  %v642_v62 = vpop.eup %641 }
 0x177   :  { %v263_v55 = vsel %vm261_vm1, %v262_v51, %v640_v50  ;;  %v372_v56 = vsel %vm370_vm2, %v262_v51, %v640_v50  ;;  %v644_v6 = vpop.eup %643 }
 0x178   :  { %v260_v57 = vsel %vm258_vm3, %v638_v26, %v259_v54  ;;  %v369_v58 = vsel %vm367_vm4, %v638_v26, %v259_v54 }
 0x179   :  { %v264_v59 = vsel %vm257_vm5, %v260_v57, %v263_v55  ;;  %v373_v61 = vsel %vm366_vm6, %v369_v58, %v372_v56 }
 0x17a   :  { %v265_v63 = vsel %vm254_vm8, nan, %v264_v59  ;;  %v374_v0 = vsel %vm254_vm8, nan, %v373_v61 }
 0x17b   :  { %v267_v20 = vmul.f32 %v642_v62, %v265_v63  ;;  %v375_v4 = vsub.f32 1.0, %v374_v0 }
 0x17d   :  { %v268_v12 = vsel %vm156_vm7, %v161_v3, %v267_v20  ;;  %v377_v17 = vmul.f32 %v644_v6, %v375_v4 }
 0x17e   :  { %v384_v19 = vsub.f32 0.0, %v268_v12  ;;  %v408_v22 = vmul.f32 %v268_v12, %v794_v8  ;;  %v394_v23 = vmul.f32 %v390_v9, %v268_v12  ;;  %v397_v24 = vmul.f32 %v386_v7, %v268_v12 }
 0x17f   :  { %v378_v25 = vsel %vm156_vm7, %v271_v16, %v377_v17  ;;  %vm535_vm7 = vcmask 1040384  }
 0x180   :  { %v388_v30 = vmul.f32 %v386_v7, %v384_v19  ;;  %v389_v31 = vmul.f32 %v378_v25, %v794_v8  ;;  %v402_v32 = vmul.f32 %v384_v19, %v794_v8  ;;  %v406_v33 = vmul.f32 %v390_v9, %v384_v19 }
 0x181   :  { %v382_v34 = vmul.f32 %v380_v27, %v378_v25  ;;  %v400_v35 = vmul.f32 %v800_v14, %v378_v25  ;;  %v403_v36 = vmul.f32 %v390_v9, %v378_v25  ;;  %v410_v15 = vmul.f32 %v378_v25, %v798_v13 }
 0x182   :  { %v392_v37 = vmul.f32 %v390_v9, %v389_v31  ;;  %v395_v38 = vmul.f32 %v389_v31, %v386_v7 }
 0x183   :  { %v383_v41 = vsub.f32 1.0, %v382_v34  ;;  %v401_v42 = vsub.f32 1.0, %v400_v35  ;;  %v404_v43 = vmul.f32 %v403_v36, %v386_v7  ;;  %v411_v26 = vsub.f32 1.0, %v410_v15 }
 0x184   :  { %v393_v45 = vadd.f32 %v392_v37, %v388_v30  ;;  %v407_v46 = vadd.f32 %v406_v33, %v395_v38  ;;  %v396_v47 = vadd.f32 %v395_v38, %v394_v23  ;;  %v398_v48 = vadd.f32 %v397_v24, %v392_v37 }
 0x185   :  { %v405_v49 = vadd.f32 %v404_v43, %v402_v32  ;;  %v409_v14 = vadd.f32 %v408_v22, %v404_v43  ;;  %v425_v13 = vmul.f32 %v853_v52, %v383_v41  ;;  %v433_v53 = vmul.f32 %v855_v21, %v383_v41 }
 0x186   :  { %v427_v50 = vmul.f32 %v869_v1, %v393_v45  ;;  %v430_v51 = vmul.f32 %v880_v10, %v396_v47  ;;  %v435_v54 = vmul.f32 %v875_v5, %v393_v45  ;;  %v438_v55 = vmul.f32 %v888_v18, %v396_v47 }
 0x187   :  { %v441_v56 = vmul.f32 %v872_v2, %v383_v41  ;;  %v443_v57 = vmul.f32 %v883_v11, %v393_v45  ;;  %v448_v58 = vmul.f32 %v853_v52, %v398_v48  ;;  %v446_v61 = vmul.f32 %v895_v28, %v396_v47 }
 0x188   :  { %v428_v59 = vadd.f32 %v427_v50, %v425_v13  ;;  %v436_v60 = vadd.f32 %v435_v54, %v433_v53  ;;  %v449_v62 = vmul.f32 %v869_v1, %v401_v42  ;;  %v451_v0 = vmul.f32 %v880_v10, %v405_v49 }
 0x189   :  { %v444_v63 = vadd.f32 %v443_v57, %v441_v56  ;;  %v453_v3 = vmul.f32 %v855_v21, %v398_v48  ;;  %v454_v20 = vmul.f32 %v875_v5, %v401_v42  ;;  %v458_v9 = vmul.f32 %v872_v2, %v398_v48 }
 0x18a   :  { %v431_v4 = vadd.f32 %v430_v51, %v428_v59  ;;  %v439_v6 = vadd.f32 %v438_v55, %v436_v60  ;;  %v450_v7 = vadd.f32 %v449_v62, %v448_v58  ;;  %v456_v17 = vmul.f32 %v888_v18, %v405_v49 }
 0x18b   :  { %v447_v12 = vadd.f32 %v446_v61, %v444_v63  ;;  %v455_v16 = vadd.f32 %v454_v20, %v453_v3  ;;  %v459_v19 = vmul.f32 %v883_v11, %v401_v42  ;;  %v461_v23 = vmul.f32 %v895_v28, %v405_v49 }
 0x18c   :  { %v452_v22 = vadd.f32 %v451_v0, %v450_v7  ;;  %v463_v24 = vmul.f32 %v853_v52, %v407_v46  ;;  %v464_v25 = vmul.f32 %v869_v1, %v409_v14  ;;  %v468_v31 = vmul.f32 %v855_v21, %v407_v46 }
 0x18d   :  { %v457_v27 = vadd.f32 %v456_v17, %v455_v16  ;;  %v460_v30 = vadd.f32 %v459_v19, %v458_v9  ;;  %v469_v32 = vmul.f32 %v875_v5, %v409_v14  ;;  %v466_v34 = vmul.f32 %v880_v10, %v411_v26 }
 0x18e   :  { %v465_v33 = vadd.f32 %v464_v25, %v463_v24  ;;  %v473_v35 = vmul.f32 %v872_v2, %v407_v46  ;;  %v474_v36 = vmul.f32 %v883_v11, %v409_v14  ;;  %v471_v38 = vmul.f32 %v888_v18, %v411_v26 }
 0x18f   :  { %v462_v15 = vadd.f32 %v461_v23, %v460_v30  ;;  %v470_v37 = vadd.f32 %v469_v32, %v468_v31  ;;  %v476_v52 = vmul.f32 %v895_v28, %v411_v26  ;;  %v479_v13 = vmul.f32 %v898_v29, %v383_v41 }
 0x190   :  { %v467_v1 = vadd.f32 %v466_v34, %v465_v33  ;;  %v475_v43 = vadd.f32 %v474_v36, %v473_v35  ;;  %v481_v21 = vmul.f32 %v905_v39, %v393_v45  ;;  %v484_v50 = vmul.f32 %v908_v40, %v396_v47 }
 0x191   :  { %v472_v5 = vadd.f32 %v471_v38, %v470_v37  ;;  %v489_v10 = vmul.f32 %v898_v29, %v398_v48  ;;  %v490_v2 = vmul.f32 %v905_v39, %v401_v42  ;;  %v497_v53 = vmul.f32 %v898_v29, %v407_v46 }
 0x192   :  { %v477_v11 = vadd.f32 %v476_v52, %v475_v43  ;;  %v482_v51 = vadd.f32 %v481_v21, %v479_v13  ;;  %v498_v18 = vmul.f32 %v905_v39, %v409_v14  ;;  %v492_v54 = vmul.f32 %v908_v40, %v405_v49 }
 0x193   :  { %v491_v28 = vadd.f32 %v490_v2, %v489_v10  ;;  %v506_v55 = vrot.slane %v439_v6, 7  ;;  %v509_v41 = vrot.slane %v447_v12, 6  ;;  %v500_v57 = vmul.f32 %v908_v40, %v411_v26 }
 0x194   :  { %v485_v56 = vadd.f32 %v484_v50, %v482_v51  ;;  %v499_v45 = vadd.f32 %v498_v18, %v497_v53  ;;  %v494_v48 = vrot.slane %v794_v8, 4  ;;  %v527_v42 = vrot.slane %v472_v5, 7 }
 0x195   :  { %v493_v47 = vadd.f32 %v492_v54, %v491_v28  ;;  %v530_v58 = vrot.slane %v477_v11, 6  ;;  %v502_v39 = vrot.slane %v794_v8, 5  ;;  %v536_v49 = vsel %vm535_vm7, %v431_v4, %v506_v55 }
 0x196   :  { %v488_v29 = vadd.f32 %v486_v44, %v485_v56  ;;  %v501_v46 = vadd.f32 %v500_v57, %v499_v45  ;;  %v538_v59 = vsel %vm537_vm9, %v536_v49, %v509_v41  ;;  %v549_v40 = vsel %vm535_vm7, %v467_v1, %v527_v42 }
 0x197   :  { %v496_v14 = vadd.f32 %v494_v48, %v493_v47  ;;  %v550_v61 = vsel %vm537_vm9, %v549_v40, %v530_v58  ;;  %v515_v62 = vrot.slane %v452_v22, 4  ;;  %v518_v63 = vrot.slane %v457_v27, 3 }
 0x198   :  { %v504_v26 = vadd.f32 %v502_v39, %v501_v46  ;;  %v512_v60 = vrot.slane %v488_v29, 5  ;;  %v521_v8 = vrot.slane %v462_v15, 2 }
 0x199   :  { %v524_v20 = vrot.slane %v496_v14, 1 }
 0x19a   :  { %v533_v44 = vrot.slane %v504_v26, 5  ;;  %v540_v0 = vsel %vm539_vm10, %v538_v59, %v512_v60 }
 0x19b   :  { %v542_v3 = vsel %vm541_vm11, %v540_v0, %v515_v62 }
 0x19c   :  { %v544_v4 = vsel %vm543_vm12, %v542_v3, %v518_v63  ;;  %v551_v6 = vsel %vm539_vm10, %v550_v61, %v533_v44 }
 0x19d   :  { %v546_v7 = vsel %vm545_vm13, %v544_v4, %v521_v8  ;;  %v552_v9 = vsel %vm541_vm11, %v551_v6, 0.0 }
 0x19e   :  { %v548_v12 = vsel %vm547_vm14, %v546_v7, %v524_v20  ;;  %v553_v16 = vsel %vm543_vm12, %v552_v9, 0.0 }
 0x19f   :  { %v554_v17 = vsel %vm545_vm13, %v553_v16, 0.0  ;;  %556 = vst [vmem:[#allocation9] sm:$0xff] %v548_v12 }
 0x1a0   :  { %v555_v19 = vsel %vm547_vm14, %v554_v17, 1.0 }
 0x1a1   :  { %557 = vst [vmem:[#allocation9 + $0x8] sm:$0xff] %v555_v19 }
 0x1a2   :  { %712 = shalt.err (!%p709_p11)
}
 0x1a3   :  { %s713_s29 = scalar_lea.hbm %s976_s3, 256 }
 0x1a4   :  { %p714_p12 = scmp.ne.s32.totalorder %s976_s3, %s713_s29  ;;  %p717_p13 = scmp.lt.u32.totalorder %s713_s29, %s976_s3 }
 0x1a6   :  { %p719_p0 = pnand %p717_p13, %p714_p12 }
 0x1a8   :  { %722 = shalt.err (!%p719_p0)
}
 0x1a9   :  { %s745_s7 = smov 128   ;;  %s746_s0 = smov 8  }
 0x1aa   :  { %569 = dma.vmem_to_hbm [thread:$0]  %s564_s25, 256, %s976_s3, [#allocation4], %s745_s7, %s745_s7, %s746_s0  }
 0x1ab   :  { %729 = dma.done.wait [#allocation4], 256  }
 0x1ac   :  { %730 = vsyncadd [#allocation4], 4294967040 }
 0x1ad   :  { %573 = vsyncpa [#allocation3], 1 }
 0x1ae   :  { %574 = vsyncpa [#allocation7], 1 }
 0x1af   :  { %575 = vsyncpa [#allocation4], 1 }
 0x1b0   :  { %576 = vsyncpa [#allocation5], 1 }

</bundles_post_ra>
